<compile_context>
chip_gen: v7x
topology: tpu7x:2x2x1
jax: 0.10.0
libtpu: 0.0.40
codegen_flags: <defaults>
</compile_context>

<pallas_src>
import jax
import jax.numpy as jnp
from jax.experimental import pallas as pl
from jax.experimental.pallas import tpu as pltpu


# ------------------------------ Pallas kernel ------------------------------- #

def small_conv_kernel(x_ref, m_ref, g_ref, gt_ref, gb_ref, w1_ref, bvec_ref,
                      w2_ref, o_ref):
    """Fused SmallConv forward.

    x_ref:    [B, C*25]     input, row-major (c, h, w) flatten of NCHW x
    m_ref:    [C*25, F*25]  dense linearization of the 3x3 pad=1 conv;
                            output columns ordered (f, h, w)
    g_ref:    [F*25, F]     0/1 group matrix (column f sums that channel's 25 lanes)
    gt_ref:   [F, F*25]     its transpose (broadcast per-channel values to lanes)
    gb_ref:   [2, F]        row 0 = BN gamma, row 1 = BN beta
    w1_ref:   [F*25, H]     lin1 weight, pre-transposed
    bvec_ref: [2, max(H,A)] row 0 = b1 (padded), row 1 = b2 (padded)
    w2_ref:   [H, A]        lin_final weight, pre-transposed
    o_ref:    [B, A]        sigmoid(lin_final(relu(lin1(flatten(tanh(BN(conv(x))))))))
    """
    f32 = jnp.float32

    # --- conv as one dense matmul (conv bias omitted: cancels under batch BN) ---
    pre = jnp.dot(x_ref[...], m_ref[...], preferred_element_type=f32)   # [B, F*25]

    # --- BatchNorm2d (training-mode batch stats), one-pass sum / sum-of-squares ---
    F_ = g_ref.shape[1]
    n = pre.shape[0] * (pre.shape[1] // F_)           # N*H*W = B*25 (real rows)
    inv_n = 1.0 / n
    s1 = jnp.sum(pre, axis=0, keepdims=True)          # [1, F*25]
    s2 = jnp.sum(pre * pre, axis=0, keepdims=True)    # [1, F*25]
    mean_f = jnp.dot(s1, g_ref[...], preferred_element_type=f32) * inv_n   # [1, F]
    ey2_f = jnp.dot(s2, g_ref[...], preferred_element_type=f32) * inv_n    # [1, F]
    var_f = ey2_f - mean_f * mean_f                   # biased variance (PyTorch fwd)
    gamma = gb_ref[0:1, :]
    beta = gb_ref[1:2, :]
    scale_f = gamma * jax.lax.rsqrt(var_f + 1e-5)     # [1, F]
    shift_f = beta - mean_f * scale_f                 # [1, F]
    scale = jnp.dot(scale_f, gt_ref[...], preferred_element_type=f32)      # [1, F*25]
    shift = jnp.dot(shift_f, gt_ref[...], preferred_element_type=f32)      # [1, F*25]
    a = jnp.tanh(pre * scale + shift)                 # [B, F*25], already (f,h,w) order

    # --- lin1 -> relu -> lin_final -> sigmoid (all in VMEM/vregs) ---
    H_ = w1_ref.shape[1]
    A_ = w2_ref.shape[1]
    h = jnp.dot(a, w1_ref[...], preferred_element_type=f32) + bvec_ref[0:1, :H_]
    h = jnp.maximum(h, 0.0)
    z = jnp.dot(h, w2_ref[...], preferred_element_type=f32) + bvec_ref[1:2, :A_]
    o_ref[...] = jax.nn.sigmoid(z)


_VMEM = pl.BlockSpec(memory_space=pltpu.MemorySpace.VMEM)


# ------------------------------- JAX wrappers -------------------------------- #

def prepare_params(params):
    """One-time weight-layout prep (hoisted out of the per-call forward path)."""
    Wc, bc, gamma, beta, W1, b1, W2, b2 = params
    del bc  # conv bias cancels exactly under train-mode (batch-stat) BatchNorm.
    # TODO(synk): if eval-mode BN (running stats) is ever needed, reinstate the
    # conv bias and plumb running_mean/running_var through instead of batch stats.
    F_, C = Wc.shape[0], Wc.shape[1]
    H_, A_ = W1.shape[0], W2.shape[0]

    # Dense linearization of Conv2d(kernel=3, padding=1) on a fixed 5x5 grid:
    #   M[(c, i, j), (f, h, w)] = Wc[f, c, i-h+1, j-w+1] when the tap is in range;
    # out-of-range taps correspond to the zero padding and are dropped.
    idx = jnp.arange(5)
    k = jnp.arange(3)
    D = (idx[None, :, None] == idx[None, None, :] + k[:, None, None] - 1)
    D = D.astype(jnp.float32)                                    # [3, i, h]
    M = jnp.einsum("fckl,kih,ljw->cijfhw", Wc, D, D).reshape(C * 25, F_ * 25)

    G = jnp.repeat(jnp.eye(F_, dtype=jnp.float32), 25, axis=0)   # [F*25, F]
    Gt = G.T                                                     # [F, F*25]
    gb = jnp.stack([gamma, beta], axis=0)                        # [2, F]
    P = max(H_, A_)
    bvec = jnp.zeros((2, P), jnp.float32)
    bvec = bvec.at[0, :H_].set(b1).at[1, :A_].set(b2)            # packed biases
    return (M, G, Gt, gb, W1.T, bvec, W2.T)


def small_conv_forward(x, kparams):
    """x: [B, state_dim, 5, 5] float32 (NCHW). Returns [B, action_dim]."""
    M, G, Gt, gb, W1t, bvec, W2t = kparams
    B = x.shape[0]
    C25, F25 = M.shape
    F_ = G.shape[1]
    H_ = W1t.shape[1]
    A_ = W2t.shape[1]
    x2d = x.reshape(B, C25)        # free view: row-major (c, h, w) flatten

    flops = 2 * (B * C25 * F25 + 2 * F25 * F_ + 2 * F_ * F25
                 + B * F25 * H_ + B * H_ * A_)
    transcendentals = B * F25 + B * A_ + F_
    bytes_accessed = 4 * (B * C25 + C25 * F25 + 2 * F25 * F_ + 2 * F_
                          + F25 * H_ + bvec.size + H_ * A_ + B * A_)

    return pl.pallas_call(
        small_conv_kernel,
        out_shape=jax.ShapeDtypeStruct((B, A_), jnp.float32),
        in_specs=[_VMEM] * 8,
        out_specs=_VMEM,
        cost_estimate=pl.CostEstimate(flops=flops,
                                      transcendentals=transcendentals,
                                      bytes_accessed=bytes_accessed),
    )(x2d, M, G, Gt, gb, W1t, bvec, W2t)


def init_params(key, state_dim, action_dim, n_filter, n_hidden):
    """Deterministic synthetic parameters (PyTorch-default-like uniform init)."""
    feature_size = n_filter * 25
    ks = jax.random.split(key, 6)

    def u(k, shape, fan_in):
        bound = 1.0 / jnp.sqrt(fan_in)
        return jax.random.uniform(k, shape, jnp.float32, -bound, bound)

    Wc = u(ks[0], (n_filter, state_dim, 3, 3), state_dim * 9)
    bc = u(ks[1], (n_filter,), state_dim * 9)
    gamma = jnp.ones((n_filter,), jnp.float32)
    beta = jnp.zeros((n_filter,), jnp.float32)
    W1 = u(ks[2], (n_hidden, feature_size), feature_size)
    b1 = u(ks[3], (n_hidden,), feature_size)
    W2 = u(ks[4], (action_dim, n_hidden), n_hidden)
    b2 = u(ks[5], (action_dim,), n_hidden)
    return (Wc, bc, gamma, beta, W1, b1, W2, b2)


def reference_forward(x, params):
    """Pure-JAX reference (mirrors the PyTorch train-mode forward, incl. conv bias)."""
    Wc, bc, gamma, beta, W1, b1, W2, b2 = params
    B, C, Hs, Ws = x.shape
    F_ = Wc.shape[0]
    hi = jax.lax.Precision.HIGHEST
    xp = jnp.pad(x, ((0, 0), (0, 0), (1, 1), (1, 1)))
    cols = [xp[:, :, kh:kh + Hs, kw:kw + Ws] for kh in range(3) for kw in range(3)]
    patches = jnp.stack(cols, axis=-1)                            # [B, C, H, W, 9]
    patches = jnp.transpose(patches, (0, 2, 3, 1, 4)).reshape(B * Hs * Ws, C * 9)
    y = jnp.dot(patches, Wc.reshape(F_, C * 9).T, precision=hi) + bc
    mean = jnp.mean(y, axis=0, keepdims=True)
    var = jnp.mean((y - mean) ** 2, axis=0, keepdims=True)
    yh = (y - mean) * jax.lax.rsqrt(var + 1e-5) * gamma + beta
    act = jnp.tanh(yh)                                            # [B*25, F]
    feats = jnp.transpose(act.reshape(B, Hs * Ws, F_), (0, 2, 1)).reshape(B, F_ * Hs * Ws)
    h = jnp.maximum(jnp.dot(feats, W1.T, precision=hi) + b1, 0.0)
    return jax.nn.sigmoid(jnp.dot(h, W2.T, precision=hi) + b2)


if __name__ == "__main__":
    # Spatial must be 5x5 (the module's feature_size = n_filter * 25).
    B, state_dim, action_dim, n_filter, n_hidden = 2, 4, 4, 8, 32

    key = jax.random.PRNGKey(0)
    kx, kp = jax.random.split(key)
    x = jax.random.normal(kx, (B, state_dim, 5, 5), jnp.float32)
    params = init_params(kp, state_dim, action_dim, n_filter, n_hidden)

    kparams = prepare_params(params)              # one-time layout prep
    fwd = jax.jit(small_conv_forward)
    out = jax.block_until_ready(fwd(x, kparams))

    ref = reference_forward(x, params)
    err = float(jnp.max(jnp.abs(out - ref)))

    assert out.shape == (B, action_dim)
    assert bool(jnp.all(jnp.isfinite(out)))
    assert err < 3e-3, f"mismatch vs pure-JAX reference: max abs err {err}"
    print("KERNEL_OK")
</pallas_src>

<mosaic_0001>
module attributes {stable_mosaic.version = 11 : i64} {
  func.func @small_conv_kernel(%arg0: memref<2x100xf32, #tpu.memory_space<vmem>>, %arg1: memref<100x200xf32, #tpu.memory_space<vmem>>, %arg2: memref<200x8xf32, #tpu.memory_space<vmem>>, %arg3: memref<8x200xf32, #tpu.memory_space<vmem>>, %arg4: memref<2x8xf32, #tpu.memory_space<vmem>>, %arg5: memref<200x32xf32, #tpu.memory_space<vmem>>, %arg6: memref<2x32xf32, #tpu.memory_space<vmem>>, %arg7: memref<32x4xf32, #tpu.memory_space<vmem>>, %arg8: memref<2x4xf32, #tpu.memory_space<vmem>>) attributes {dimension_semantics = [], scalar_prefetch = 0 : i64, scratch_operands = 0 : i64, tpu.core_type = #tpu.core_type<tc>} {
    %c0 = arith.constant 0 : index
    %c0_0 = arith.constant 0 : index
    %0 = vector.load %arg0[%c0, %c0_0] : memref<2x100xf32, #tpu.memory_space<vmem>>, vector<2x100xf32>
    %c0_1 = arith.constant 0 : index
    %c0_2 = arith.constant 0 : index
    %1 = vector.load %arg1[%c0_1, %c0_2] : memref<100x200xf32, #tpu.memory_space<vmem>>, vector<100x200xf32>
    %cst = arith.constant dense<0.000000e+00> : vector<2x200xf32>
    %2 = tpu.matmul %0, %1, %cst {dimension_numbers = #tpu.dot_dimension_numbers<[1], [0], [0], [1], [0, 0, 1, 1], [], []>} : vector<2x100xf32>, vector<100x200xf32>, vector<2x200xf32> -> vector<2x200xf32>
    %cst_3 = arith.constant dense<0.000000e+00> : vector<200xf32>
    %3 = vector.multi_reduction <add>, %2, %cst_3 [0] : vector<2x200xf32> to vector<200xf32>
    %4 = vector.shape_cast %3 : vector<200xf32> to vector<1x200xf32>
    %5 = arith.mulf %2, %2 : vector<2x200xf32>
    %cst_4 = arith.constant dense<0.000000e+00> : vector<200xf32>
    %6 = vector.multi_reduction <add>, %5, %cst_4 [0] : vector<2x200xf32> to vector<200xf32>
    %7 = vector.shape_cast %6 : vector<200xf32> to vector<1x200xf32>
    %c0_5 = arith.constant 0 : index
    %c0_6 = arith.constant 0 : index
    %8 = vector.load %arg2[%c0_5, %c0_6] : memref<200x8xf32, #tpu.memory_space<vmem>>, vector<200x8xf32>
    %cst_7 = arith.constant dense<0.000000e+00> : vector<1x8xf32>
    %9 = tpu.matmul %4, %8, %cst_7 {dimension_numbers = #tpu.dot_dimension_numbers<[1], [0], [0], [1], [0, 0, 1, 1], [], []>} : vector<1x200xf32>, vector<200x8xf32>, vector<1x8xf32> -> vector<1x8xf32>
    %cst_8 = arith.constant 2.000000e-02 : f32
    %10 = vector.broadcast %cst_8 : f32 to vector<1x8xf32>
    %11 = arith.mulf %9, %10 : vector<1x8xf32>
    %c0_9 = arith.constant 0 : index
    %c0_10 = arith.constant 0 : index
    %12 = vector.load %arg2[%c0_9, %c0_10] : memref<200x8xf32, #tpu.memory_space<vmem>>, vector<200x8xf32>
    %cst_11 = arith.constant dense<0.000000e+00> : vector<1x8xf32>
    %13 = tpu.matmul %7, %12, %cst_11 {dimension_numbers = #tpu.dot_dimension_numbers<[1], [0], [0], [1], [0, 0, 1, 1], [], []>} : vector<1x200xf32>, vector<200x8xf32>, vector<1x8xf32> -> vector<1x8xf32>
    %cst_12 = arith.constant 2.000000e-02 : f32
    %14 = vector.broadcast %cst_12 : f32 to vector<1x8xf32>
    %15 = arith.mulf %13, %14 : vector<1x8xf32>
    %16 = arith.mulf %11, %11 : vector<1x8xf32>
    %17 = arith.subf %15, %16 : vector<1x8xf32>
    %c0_13 = arith.constant 0 : index
    %c0_14 = arith.constant 0 : index
    %18 = vector.load %arg4[%c0_13, %c0_14] : memref<2x8xf32, #tpu.memory_space<vmem>>, vector<1x8xf32>
    %c1 = arith.constant 1 : index
    %c0_15 = arith.constant 0 : index
    %19 = vector.load %arg4[%c1, %c0_15] : memref<2x8xf32, #tpu.memory_space<vmem>>, vector<1x8xf32>
    %cst_16 = arith.constant 9.99999974E-6 : f32
    %20 = vector.broadcast %cst_16 : f32 to vector<1x8xf32>
    %21 = arith.addf %17, %20 : vector<1x8xf32>
    %22 = math.rsqrt %21 : vector<1x8xf32>
    %23 = arith.mulf %18, %22 : vector<1x8xf32>
    %24 = arith.mulf %11, %23 : vector<1x8xf32>
    %25 = arith.subf %19, %24 : vector<1x8xf32>
    %c0_17 = arith.constant 0 : index
    %c0_18 = arith.constant 0 : index
    %26 = vector.load %arg3[%c0_17, %c0_18] : memref<8x200xf32, #tpu.memory_space<vmem>>, vector<8x200xf32>
    %cst_19 = arith.constant dense<0.000000e+00> : vector<1x200xf32>
    %27 = tpu.matmul %23, %26, %cst_19 {dimension_numbers = #tpu.dot_dimension_numbers<[1], [0], [0], [1], [0, 0, 1, 1], [], []>} : vector<1x8xf32>, vector<8x200xf32>, vector<1x200xf32> -> vector<1x200xf32>
    %c0_20 = arith.constant 0 : index
    %c0_21 = arith.constant 0 : index
    %28 = vector.load %arg3[%c0_20, %c0_21] : memref<8x200xf32, #tpu.memory_space<vmem>>, vector<8x200xf32>
    %cst_22 = arith.constant dense<0.000000e+00> : vector<1x200xf32>
    %29 = tpu.matmul %25, %28, %cst_22 {dimension_numbers = #tpu.dot_dimension_numbers<[1], [0], [0], [1], [0, 0, 1, 1], [], []>} : vector<1x8xf32>, vector<8x200xf32>, vector<1x200xf32> -> vector<1x200xf32>
    %30 = vector.broadcast %27 : vector<1x200xf32> to vector<2x200xf32>
    %31 = arith.mulf %2, %30 : vector<2x200xf32>
    %32 = vector.broadcast %29 : vector<1x200xf32> to vector<2x200xf32>
    %33 = arith.addf %31, %32 : vector<2x200xf32>
    %34 = math.tanh %33 : vector<2x200xf32>
    %c0_23 = arith.constant 0 : index
    %c0_24 = arith.constant 0 : index
    %35 = vector.load %arg5[%c0_23, %c0_24] : memref<200x32xf32, #tpu.memory_space<vmem>>, vector<200x32xf32>
    %cst_25 = arith.constant dense<0.000000e+00> : vector<2x32xf32>
    %36 = tpu.matmul %34, %35, %cst_25 {dimension_numbers = #tpu.dot_dimension_numbers<[1], [0], [0], [1], [0, 0, 1, 1], [], []>} : vector<2x200xf32>, vector<200x32xf32>, vector<2x32xf32> -> vector<2x32xf32>
    %c0_26 = arith.constant 0 : index
    %c0_27 = arith.constant 0 : index
    %37 = vector.load %arg6[%c0_26, %c0_27] : memref<2x32xf32, #tpu.memory_space<vmem>>, vector<1x32xf32>
    %38 = vector.broadcast %37 : vector<1x32xf32> to vector<2x32xf32>
    %39 = arith.addf %36, %38 : vector<2x32xf32>
    %cst_28 = arith.constant 0.000000e+00 : f32
    %40 = vector.broadcast %cst_28 : f32 to vector<2x32xf32>
    %41 = arith.maximumf %39, %40 : vector<2x32xf32>
    %c0_29 = arith.constant 0 : index
    %c0_30 = arith.constant 0 : index
    %42 = vector.load %arg7[%c0_29, %c0_30] : memref<32x4xf32, #tpu.memory_space<vmem>>, vector<32x4xf32>
    %cst_31 = arith.constant dense<0.000000e+00> : vector<2x4xf32>
    %43 = tpu.matmul %41, %42, %cst_31 {dimension_numbers = #tpu.dot_dimension_numbers<[1], [0], [0], [1], [0, 0, 1, 1], [], []>} : vector<2x32xf32>, vector<32x4xf32>, vector<2x4xf32> -> vector<2x4xf32>
    %c1_32 = arith.constant 1 : index
    %c0_33 = arith.constant 0 : index
    %44 = vector.load %arg6[%c1_32, %c0_33] : memref<2x32xf32, #tpu.memory_space<vmem>>, vector<1x4xf32>
    %45 = vector.broadcast %44 : vector<1x4xf32> to vector<2x4xf32>
    %46 = arith.addf %43, %45 : vector<2x4xf32>
    %47 = arith.negf %46 : vector<2x4xf32>
    %48 = math.exp %47 : vector<2x4xf32>
    %cst_34 = arith.constant 1.000000e+00 : f32
    %49 = vector.broadcast %cst_34 : f32 to vector<2x4xf32>
    %50 = arith.addf %49, %48 : vector<2x4xf32>
    %51 = arith.divf %49, %50 : vector<2x4xf32>
    %c0_35 = arith.constant 0 : index
    %c0_36 = arith.constant 0 : index
    %52 = vector.load %arg8[%c0_35, %c0_36] : memref<2x4xf32, #tpu.memory_space<vmem>>, vector<2x4xf32>
    tpu.vector_store %arg8[%c0_35, %c0_36], %51 {strides = array<i32>} : memref<2x4xf32, #tpu.memory_space<vmem>>, vector<2x4xf32>,
    return
  }
}

</mosaic_0001>

<bundles_post_ra>
// kernel: small_conv_forward.1
= control target key start
LH: loop header
LB: loop body
LE: loop exit
PB: predicated region body
PF: predicated region fallthrough
CT: control target
= control target key end

     0   :  { %v940_v7 = vmov 0.0   ;;  %v941_v13 = vmov 0.0|0.0   ;;  %s1322_s0 = inlined_call_operand.vmem [shape: f32[2,100], index: 0, kind: input, shape index: {}]   ;;  %s1323_s1 = inlined_call_operand.vmem [shape: f32[100,200], index: 1, kind: input, shape index: {}]   ;;  %s1324_s2 = inlined_call_operand.vmem [shape: f32[200,8], index: 2, kind: input, shape index: {}]   ;;  %s1325_s3 = inlined_call_operand.vmem [shape: f32[8,200], index: 3, kind: input, shape index: {}]   ;;  %s1326_s4 = inlined_call_operand.vmem [shape: f32[2,8], index: 4, kind: input, shape index: {}]   ;;  %s1327_s5 = inlined_call_operand.vmem [shape: f32[200,32], index: 5, kind: input, shape index: {}]   ;;  %s1328_s6 = inlined_call_operand.vmem [shape: f32[2,32], index: 6, kind: input, shape index: {}]   ;;  %s1329_s7 = inlined_call_operand.vmem [shape: f32[32,4], index: 7, kind: input, shape index: {}]   ;;  %s1330_s8 = inlined_call_operand.hbm [shape: f32[2,4], index: 8, kind: output, shape index: {}]  }
   0x1   :  { %v32_v0 = vld [vmem:[%s1323_s1 + $0x8] sm:$0xff]  ;;  %v34_v1 = vld [vmem:[%s1323_s1 + $0x18] sm:$0xff]  ;;  %v31_v2 = vld [vmem:[%s1323_s1] sm:$0xff]  ;;  %132 = vmatprep.mubr.f32.mxu0 %v940_v7  ;;  %788 = vmatprep.subr.bf16.mxu1 %v941_v13 }
   0x2   :  { %v764_v3 = vpack.c.bf16 %v34_v1, %v32_v0  ;;  %v33_v4 = vld [vmem:[%s1323_s1 + $0x10] sm:$0xff]  ;;  %v36_v5 = vld [vmem:[%s1323_s1 + $0x28] sm:$0xff]  ;;  %v38_v6 = vld [vmem:[%s1323_s1 + $0x38] sm:$0xff] }
   0x3   :  { %v766_v8 = vpack.c.bf16 %v33_v4, %v31_v2  ;;  %v768_v9 = vpack.c.bf16 %v38_v6, %v36_v5  ;;  %v35_v10 = vld [vmem:[%s1323_s1 + $0x20] sm:$0xff]  ;;  %v37_v11 = vld [vmem:[%s1323_s1 + $0x30] sm:$0xff]  ;;  %v40_v12 = vld [vmem:[%s1323_s1 + $0x48] sm:$0xff] }
   0x4   :  { %765 = vmatprep.subr.bf16.mxu0 %v764_v3  ;;  %v42_v14 = vld [vmem:[%s1323_s1 + $0x58] sm:$0xff]  ;;  %v770_v15 = vpack.c.bf16 %v37_v11, %v35_v10  ;;  %v39_v17 = vld [vmem:[%s1323_s1 + $0x40] sm:$0xff]  ;;  %v41_v18 = vld [vmem:[%s1323_s1 + $0x50] sm:$0xff] }
   0x5   :  { %767 = vmatpush1.bf16.msra.mxu0 %v766_v8  ;;  %v772_v16 = vpack.c.bf16 %v42_v14, %v40_v12  ;;  %v44_v19 = vld [vmem:[%s1323_s1 + $0x68] sm:$0xff]  ;;  %v46_v20 = vld [vmem:[%s1323_s1 + $0x78] sm:$0xff]  ;;  %v774_v21 = vpack.c.bf16 %v41_v18, %v39_v17  ;;  %v43_v22 = vld [vmem:[%s1323_s1 + $0x60] sm:$0xff] }
   0x6   :  { %769 = vmatprep.subr.bf16.mxu0 %v768_v9  ;;  %v45_v23 = vld [vmem:[%s1323_s1 + $0x70] sm:$0xff]  ;;  %v776_v24 = vpack.c.bf16 %v46_v20, %v44_v19  ;;  %v171_v25 = vld [vmem:[%s1324_s2] sm:$0xff]  ;;  %v172_v26 = vld [vmem:[%s1324_s2 + $0x8] sm:$0xff] }
   0x7   :  { %v173_v27 = vld [vmem:[%s1324_s2 + $0x10] sm:$0xff]  ;;  %v48_v28 = vld [vmem:[%s1323_s1 + $0x88] sm:$0xff]  ;;  %v50_v29 = vld [vmem:[%s1323_s1 + $0x98] sm:$0xff]  ;;  %v789_v30 = vpack.c.bf16 %v172_v26, %v171_v25  ;;  %v778_v32 = vpack.c.bf16 %v45_v23, %v43_v22 }
   0x8   :  { %v174_v31 = vld [vmem:[%s1324_s2 + $0x18] sm:$0xff]  ;;  %v47_v33 = vld [vmem:[%s1323_s1 + $0x80] sm:$0xff]  ;;  %v780_v35 = vpack.c.bf16 %v50_v29, %v48_v28  ;;  %v49_v36 = vld [vmem:[%s1323_s1 + $0x90] sm:$0xff] }
   0x9   :  { %771 = vmatpush1.bf16.msra.mxu0 %v770_v15  ;;  %790 = vmatpush1.bf16.msra.mxu1 %v789_v30  ;;  %v792_v34 = vpack.c.bf16 %v174_v31, %v173_v27  ;;  %v175_v37 = vld [vmem:[%s1324_s2 + $0x20] sm:$0xff]  ;;  %v176_v38 = vld [vmem:[%s1324_s2 + $0x28] sm:$0xff]  ;;  %v54_v40 = vld [vmem:[%s1323_s1 + $0xb8] sm:$0xff] }
   0xa   :  { %773 = vmatprep.subr.bf16.mxu0 %v772_v16  ;;  %791 = vmatprep.subr.bf16.mxu1 %v941_v13  ;;  %v52_v39 = vld [vmem:[%s1323_s1 + $0xa8] sm:$0xff] }
   0xd   :  { %775 = vmatpush1.bf16.msra.mxu0 %v774_v21 }
   0xe   :  { %777 = vmatprep.subr.bf16.mxu0 %v776_v24 }
   0xf   :  { %13 = vsyncpa [#allocation3], 0  ;;  %v782_v41 = vpack.c.bf16 %v49_v36, %v47_v33  ;;  %v51_v42 = vld [vmem:[%s1323_s1 + $0xa0] sm:$0xff]  ;;  %793 = vmatpush1.bf16.msra.mxu1 %v792_v34  ;;  %v795_v43 = vpack.c.bf16 %v176_v38, %v175_v37  ;;  %v784_v44 = vpack.c.bf16 %v54_v40, %v52_v39  ;;  %v53_v45 = vld [vmem:[%s1323_s1 + $0xb0] sm:$0xff]  ;;  %vm61_vm0 = vcmask 1043456  }
  0x10   :  { %794 = vmatprep.subr.bf16.mxu1 %v941_v13  ;;  %v177_v46 = vld [vmem:[%s1324_s2 + $0x30] sm:$0xff]  ;;  %v178_v47 = vld [vmem:[%s1324_s2 + $0x38] sm:$0xff]  ;;  %v786_v48 = vpack.c.bf16 %v53_v45, %v51_v42  ;;  %v179_v50 = vld [vmem:[%s1324_s2 + $0x40] sm:$0xff]  ;;  %vm57_vm1 = vcmask 818176   ;;  %vm139_vm2 = vcmask 1041408   ;;  %vm147_vm3 = vcmask 582656  }
  0x11   :  { %779 = vmatpush1.bf16.msra.mxu0 %v778_v32  ;;  %v798_v49 = vpack.c.bf16 %v178_v47, %v177_v46  ;;  %v180_v51 = vld [vmem:[%s1324_s2 + $0x48] sm:$0xff]  ;;  %v55_v54 = vld [vmem:[%s1323_s1 + $0xc0] sm:$0xf]  ;;  %v181_v55 = vld [vmem:[%s1324_s2 + $0x50] sm:$0xff]  ;;  %vm196_vm4 = vcmask 588800   ;;  %vm356_vm5 = vcmask 64512  }
  0x12   :  { %781 = vmatprep.subr.bf16.mxu0 %v780_v35  ;;  %v56_v52 = vld [vmem:[%s1323_s1 + $0xc8] sm:$0xf]  ;;  %v801_v53 = vpack.c.bf16 %v180_v51, %v179_v50  ;;  %v182_v56 = vld [vmem:[%s1324_s2 + $0x58] sm:$0xff]  ;;  %v30_v57 = vld [vmem:[%s1322_s0] sm:$0x3]  ;;  %vm942_vm6 = vmmov 0  }
  0x13   :  { %796 = vmatpush1.bf16.msra.mxu1 %v795_v43  ;;  %v804_v58 = vpack.c.bf16 %v182_v56, %v181_v55  ;;  %v183_v59 = vld [vmem:[%s1324_s2 + $0x60] sm:$0xff]  ;;  %v184_v60 = vld [vmem:[%s1324_s2 + $0x68] sm:$0xff]  ;;  %v185_v62 = vld [vmem:[%s1324_s2 + $0x70] sm:$0xff]  ;;  %vm640_vm7 = vcmask 261120   ;;  %vm720_vm8 = vcmask 25600  }
  0x14   :  { %797 = vmatprep.subr.bf16.mxu1 %v941_v13  ;;  %v807_v61 = vpack.c.bf16 %v184_v60, %v183_v59  ;;  %v186_v63 = vld [vmem:[%s1324_s2 + $0x78] sm:$0xff]  ;;  %v187_v1 = vld [vmem:[%s1324_s2 + $0x80] sm:$0xff]  ;;  %v188_v2 = vld [vmem:[%s1324_s2 + $0x88] sm:$0xff] }
  0x15   :  { %783 = vmatpush1.bf16.msra.mxu0 %v782_v41  ;;  %v810_v0 = vpack.c.bf16 %v186_v63, %v185_v62  ;;  %v813_v3 = vpack.c.bf16 %v188_v2, %v187_v1  ;;  %v189_v4 = vld [vmem:[%s1324_s2 + $0x90] sm:$0xff]  ;;  %v190_v5 = vld [vmem:[%s1324_s2 + $0x98] sm:$0xff]  ;;  %v191_v8 = vld [vmem:[%s1324_s2 + $0xa0] sm:$0xff] }
  0x16   :  { %785 = vmatprep.subr.bf16.mxu0 %v784_v44  ;;  %v816_v6 = vpack.c.bf16 %v190_v5, %v189_v4  ;;  %v192_v9 = vld [vmem:[%s1324_s2 + $0xa8] sm:$0xff]  ;;  %v193_v11 = vld [vmem:[%s1324_s2 + $0xb0] sm:$0xff]  ;;  %v194_v12 = vld [vmem:[%s1324_s2 + $0xb8] sm:$0xff] }
  0x17   :  { %799 = vmatpush1.bf16.msra.mxu1 %v798_v49  ;;  %v819_v10 = vpack.c.bf16 %v192_v9, %v191_v8  ;;  %v822_v14 = vpack.c.bf16 %v194_v12, %v193_v11  ;;  %v195_v15 = vld [vmem:[%s1324_s2 + $0xc0] sm:$0xff]  ;;  %v528_v51 = vld [vmem:[%s1327_s5 + $0x8] sm:$0xff]  ;;  %v533_v59 = vld [vmem:[%s1327_s5 + $0x30] sm:$0xff] }
  0x18   :  { %800 = vmatprep.subr.bf16.mxu1 %v941_v13  ;;  %v527_v50 = vld [vmem:[%s1327_s5] sm:$0xff]  ;;  %v534_v60 = vld [vmem:[%s1327_s5 + $0x38] sm:$0xff]  ;;  %v536_v63 = vld [vmem:[%s1327_s5 + $0x48] sm:$0xff] }
  0x19   :  { %787 = vmatpush1.bf16.msra.mxu0 %v786_v48  ;;  %v355_v48 = vld [vmem:[%s1325_s3 + $0x8] sm:$0xff]  ;;  %v531_v56 = vld [vmem:[%s1327_s5 + $0x20] sm:$0xff]  ;;  %v537_v1 = vld [vmem:[%s1327_s5 + $0x50] sm:$0xff] }
  0x1a   :  { %736 = vmatprep.subr.msk.mxu0 %vm61_vm0, %v56_v52  ;;  %v529_v52 = vld [vmem:[%s1327_s5 + $0x10] sm:$0xff]  ;;  %v535_v62 = vld [vmem:[%s1327_s5 + $0x40] sm:$0xff]  ;;  %v538_v2 = vld [vmem:[%s1327_s5 + $0x58] sm:$0xff] }
  0x1b   :  { %802 = vmatpush1.bf16.msra.mxu1 %v801_v53  ;;  %v539_v4 = vld [vmem:[%s1327_s5 + $0x60] sm:$0xff]  ;;  %v540_v5 = vld [vmem:[%s1327_s5 + $0x68] sm:$0xff] }
  0x1c   :  { %803 = vmatprep.subr.bf16.mxu1 %v941_v13 }
  0x1d   :  { %737 = vmatpush1.msk.msra.mxu0 %vm61_vm0, %v55_v54  ;;  %v530_v54 = vld [vmem:[%s1327_s5 + $0x18] sm:$0xff] }
  0x1e   :  { %738 = vmatmul.mubr.msk.f32.vlgmr.msra.gmra.mrb[0].mxu0 %vm57_vm1, %v30_v57  ;;  %824 = vmatprep.subr.bf16.mxu0 %v941_v13  ;;  %v864_v55 = vpack.c.bf16 %v530_v54, %v529_v52  ;;  %v532_v57 = vld [vmem:[%s1327_s5 + $0x28] sm:$0xff] }
  0x1f   :  { %826 = vmatpush1.bf16.msra.mxu0 %v789_v30  ;;  %805 = vmatpush1.bf16.msra.mxu1 %v804_v58 }
  0x20   :  { %827 = vmatprep.subr.bf16.mxu0 %v941_v13  ;;  %806 = vmatprep.subr.bf16.mxu1 %v941_v13 }
  0x23   :  { %829 = vmatpush1.bf16.msra.mxu0 %v792_v34  ;;  %808 = vmatpush1.bf16.msra.mxu1 %v807_v61 }
  0x24   :  { %830 = vmatprep.subr.bf16.mxu0 %v941_v13  ;;  %809 = vmatprep.subr.bf16.mxu1 %v941_v13 }
  0x27   :  { %832 = vmatpush1.bf16.msra.mxu0 %v795_v43  ;;  %811 = vmatpush1.bf16.msra.mxu1 %v810_v0 }
  0x28   :  { %833 = vmatprep.subr.bf16.mxu0 %v941_v13  ;;  %812 = vmatprep.subr.bf16.mxu1 %v941_v13 }
  0x2b   :  { %835 = vmatpush1.bf16.msra.mxu0 %v798_v49  ;;  %814 = vmatpush1.bf16.msra.mxu1 %v813_v3  ;;  %v354_v49 = vld [vmem:[%s1325_s3] sm:$0xff] }
  0x2c   :  { %836 = vmatprep.subr.bf16.mxu0 %v941_v13  ;;  %815 = vmatprep.subr.bf16.mxu1 %v941_v13 }
  0x2f   :  { %838 = vmatpush1.bf16.msra.mxu0 %v801_v53  ;;  %817 = vmatpush1.bf16.msra.mxu1 %v816_v6  ;;  %v861_v53 = vpack.c.bf16 %v528_v51, %v527_v50 }
  0x30   :  { %839 = vmatprep.subr.bf16.mxu0 %v941_v13  ;;  %818 = vmatprep.subr.bf16.mxu1 %v941_v13 }
  0x33   :  { %841 = vmatpush1.bf16.msra.mxu0 %v804_v58  ;;  %820 = vmatpush1.bf16.msra.mxu1 %v819_v10  ;;  %v867_v58 = vpack.c.bf16 %v532_v57, %v531_v56 }
  0x34   :  { %842 = vmatprep.subr.bf16.mxu0 %v941_v13  ;;  %821 = vmatprep.subr.bf16.mxu1 %v941_v13 }
  0x37   :  { %844 = vmatpush1.bf16.msra.mxu0 %v807_v61  ;;  %823 = vmatpush1.bf16.msra.mxu1 %v822_v14  ;;  %v870_v61 = vpack.c.bf16 %v534_v60, %v533_v59 }
  0x38   :  { %845 = vmatprep.subr.bf16.mxu0 %v941_v13  ;;  %248 = vmatprep.subr.mxu1 %v940_v7 }
  0x3b   :  { %847 = vmatpush1.bf16.msra.mxu0 %v810_v0  ;;  %249 = vmatpush1.msra.mxu1 %v195_v15  ;;  %v873_v0 = vpack.c.bf16 %v536_v63, %v535_v62  ;;  %v743_v62 = vld [vmem:[%s1328_s6] ss:$0 sm:$0xff] }
  0x3c   :  { %848 = vmatprep.subr.bf16.mxu0 %v941_v13  ;;  %860 = vmatprep.subr.bf16.mxu1 %v941_v13 }
  0x3f   :  { %850 = vmatpush1.bf16.msra.mxu0 %v813_v3  ;;  %v876_v3 = vpack.c.bf16 %v538_v2, %v537_v1 }
  0x40   :  { %851 = vmatprep.subr.bf16.mxu0 %v941_v13 }
  0x43   :  { %853 = vmatpush1.bf16.msra.mxu0 %v816_v6  ;;  %v879_v6 = vpack.c.bf16 %v540_v5, %v539_v4 }
  0x44   :  { %854 = vmatprep.subr.bf16.mxu0 %v941_v13 }
  0x47   :  { %856 = vmatpush1.bf16.msra.mxu0 %v819_v10 }
  0x48   :  { %857 = vmatprep.subr.bf16.mxu0 %v941_v13 }
  0x4b   :  { %859 = vmatpush1.bf16.msra.mxu0 %v822_v14 }
  0x4c   :  { %322 = vmatprep.subr.mxu0 %v940_v7 }
  0x4f   :  { %323 = vmatpush1.msra.mxu0 %v195_v15 }
  0x50   :  { %360 = vmatprep.subr.mxu0 %v355_v48 }
  0xf1   :  { %v1173_v16 = vpop.f32.mrb[0].mxu0 }
  0xf2   :  { %v140_v17 = vsel %vm139_vm2, %v1173_v16, 0.0  ;;  %v155_v18 = vmul.f32 %v1173_v16, %v1173_v16  ;;  %v1178_v19 = vpop.f32.mrb[1].mxu0 }
  0xf3   :  { %v141_v20 = vrot.slane %v140_v17, 4  ;;  %v148_v21 = vsel %vm147_vm3, %v1178_v19, 0.0  ;;  %v156_v22 = vmul.f32 %v1178_v19, %v1178_v19 }
  0xf4   :  { %v157_v23 = vsel %vm139_vm2, %v155_v18, 0.0  ;;  %v149_v24 = vrot.slane %v148_v21, 4 }
  0xf5   :  { %v142_v25 = vadd.f32 %v141_v20, %v140_v17  ;;  %v158_v26 = vrot.slane %v157_v23, 4  ;;  %v164_v27 = vsel %vm147_vm3, %v156_v22, 0.0  ;;  %v347_v20 = vld [vmem:[%s1326_s4] sm:$0x1] }
  0xf6   :  { %v150_v28 = vadd.f32 %v149_v24, %v148_v21  ;;  %v165_v29 = vrot.slane %v164_v27, 4 }
  0xf7   :  { %v143_v30 = vrot.slane %v142_v25, 2  ;;  %v159_v31 = vadd.f32 %v158_v26, %v157_v23  ;;  %v348_v23 = vld [vmem:[%s1326_s4 + $0x1] sm:$0x1]  ;;  %v541_v26 = vld [vmem:[%s1327_s5 + $0x70] sm:$0xff] }
  0xf8   :  { %v166_v32 = vadd.f32 %v165_v29, %v164_v27  ;;  %v151_v33 = vrot.slane %v150_v28, 2  ;;  %v542_v27 = vld [vmem:[%s1327_s5 + $0x78] sm:$0xff]  ;;  %v543_v29 = vld [vmem:[%s1327_s5 + $0x80] sm:$0xff] }
  0xf9   :  { %v160_v34 = vrot.slane %v159_v31, 2  ;;  %v144_v35 = vadd.f32 %v143_v30, %v142_v25  ;;  %v544_v30 = vld [vmem:[%s1327_s5 + $0x88] sm:$0xff] }
  0xfa   :  { %v167_v36 = vrot.slane %v166_v32, 2  ;;  %v152_v37 = vadd.f32 %v151_v33, %v150_v28  ;;  %v882_v28 = vpack.c.bf16 %v542_v27, %v541_v26  ;;  %v546_v33 = vld [vmem:[%s1327_s5 + $0x98] sm:$0xff] }
  0xfb   :  { %v161_v38 = vadd.f32 %v160_v34, %v159_v31  ;;  %v145_v39 = vrot.slane %v144_v35, 1  ;;  %v885_v31 = vpack.c.bf16 %v544_v30, %v543_v29 }
  0xfc   :  { %v168_v40 = vadd.f32 %v167_v36, %v166_v32  ;;  %v153_v41 = vrot.slane %v152_v37, 1  ;;  %v545_v32 = vld [vmem:[%s1327_s5 + $0x90] sm:$0xff]  ;;  %v548_v36 = vld [vmem:[%s1327_s5 + $0xa8] sm:$0xff] }
  0xfd   :  { %v162_v42 = vrot.slane %v161_v38, 1  ;;  %v146_v45 = vadd.f32 %v145_v39, %v144_v35  ;;  %v888_v34 = vpack.c.bf16 %v546_v33, %v545_v32  ;;  %v547_v35 = vld [vmem:[%s1327_s5 + $0xa0] sm:$0xff]  ;;  %v550_v39 = vld [vmem:[%s1327_s5 + $0xb8] sm:$0xff] }
  0xfe   :  { %v154_v43 = vadd.f32 %v153_v41, %v152_v37  ;;  %v169_v44 = vrot.slane %v168_v40, 1  ;;  %v549_v37 = vld [vmem:[%s1327_s5 + $0xb0] sm:$0xff]  ;;  %v551_v41 = vld [vmem:[%s1327_s5 + $0xc0] sm:$0xff] }
  0xff   :  { %v163_v47 = vadd.f32 %v162_v42, %v161_v38  ;;  %v891_v38 = vpack.c.bf16 %v548_v36, %v547_v35  ;;  %v631_v42 = vld [vmem:[%s1329_s7] sm:$0xff] }
 0x100   :  { %739 = vmatprep.mubr.msk.f32.mxu1 %vm196_vm4, %v154_v43  ;;  %v170_v46 = vadd.f32 %v169_v44, %v168_v40  ;;  %v894_v40 = vpack.c.bf16 %v550_v39, %v549_v37  ;;  %v632_v43 = vld [vmem:[%s1329_s7 + $0x8] sm:$0xff] }
 0x101   :  { %265 = vmatmul.mubr.f32.vlgmr.msra.gmra.mrb[0].mxu1 %v146_v45  ;;  %v897_v44 = vpack.c.bf16 %v632_v43, %v631_v42  ;;  %v505_v45 = vlaneseq }
 0x102   :  { %740 = vmatprep.mubr.msk.f32.mxu0 %vm196_vm4, %v170_v46  ;;  %862 = vmatpush1.bf16.msra.mxu1 %v861_v53 }
 0x103   :  { %339 = vmatmul.mubr.f32.vlgmr.msra.gmra.mrb[2].mxu0 %v163_v47  ;;  %863 = vmatprep.subr.bf16.mxu1 %v941_v13  ;;  %v506_v46 = vshrl.u32 %v505_v45, 7 }
 0x104   :  { %424 = vmatprep.mubr.f32.mxu0 %v940_v7  ;;  %361 = vmatpush1.msra.mxu0 %v354_v49 }
 0x105   :  { %434 = vmatprep.subr.mxu0 %v355_v48  ;;  %v507_v47 = vsub.s32 0, %v506_v46 }
 0x106   :  { %865 = vmatpush1.bf16.msra.mxu1 %v864_v55 }
 0x107   :  { %866 = vmatprep.subr.bf16.mxu1 %v941_v13 }
 0x10a   :  { %868 = vmatpush1.bf16.msra.mxu1 %v867_v58 }
 0x10b   :  { %869 = vmatprep.subr.bf16.mxu1 %v941_v13 }
 0x10e   :  { %871 = vmatpush1.bf16.msra.mxu1 %v870_v61  ;;  %v633_v61 = vld [vmem:[%s1329_s7 + $0x10] sm:$0xff] }
 0x10f   :  { %872 = vmatprep.subr.bf16.mxu1 %v941_v13 }
 0x112   :  { %874 = vmatpush1.bf16.msra.mxu1 %v873_v0 }
 0x113   :  { %875 = vmatprep.subr.bf16.mxu1 %v941_v13 }
 0x116   :  { %877 = vmatpush1.bf16.msra.mxu1 %v876_v3  ;;  %v745_v3 = vld [vmem:[%s1328_s6 + $0x1] ss:$0 sm:$0xff] }
 0x117   :  { %878 = vmatprep.subr.bf16.mxu1 %v941_v13 }
 0x11a   :  { %880 = vmatpush1.bf16.msra.mxu1 %v879_v6 }
 0x11b   :  { %881 = vmatprep.subr.bf16.mxu1 %v941_v13 }
 0x11e   :  { %883 = vmatpush1.bf16.msra.mxu1 %v882_v28 }
 0x11f   :  { %884 = vmatprep.subr.bf16.mxu1 %v941_v13 }
 0x122   :  { %886 = vmatpush1.bf16.msra.mxu1 %v885_v31 }
 0x123   :  { %887 = vmatprep.subr.bf16.mxu1 %v941_v13 }
 0x126   :  { %889 = vmatpush1.bf16.msra.mxu1 %v888_v34 }
 0x127   :  { %890 = vmatprep.subr.bf16.mxu1 %v941_v13 }
 0x12a   :  { %892 = vmatpush1.bf16.msra.mxu1 %v891_v38 }
 0x12b   :  { %893 = vmatprep.subr.bf16.mxu1 %v941_v13 }
 0x12e   :  { %895 = vmatpush1.bf16.msra.mxu1 %v894_v40 }
 0x12f   :  { %608 = vmatprep.subr.mxu1 %v940_v7 }
 0x132   :  { %609 = vmatpush1.msra.mxu1 %v551_v41 }
 0x1d4   :  { %v266_v8 = vpop.f32.mrb[0].mxu1 }
 0x1d5   :  { %v270_v9 = vmul.f32 0.02, %v266_v8  ;;  %v268_v10 = vpop.f32.mrb[1].mxu1 }
 0x1d6   :  { %v340_v11 = vpop.f32.mrb[2].mxu0 }
 0x1d7   :  { %v345_v12 = vmul.f32 %v270_v9, %v270_v9  ;;  %v344_v14 = vmul.f32 0.02, %v340_v11  ;;  %v342_v15 = vpop.f32.mrb[3].mxu0 }
 0x1d9   :  { %v346_v17 = vsub.f32 %v344_v14, %v345_v12 }
 0x1db   :  { %v349_v18 = vadd.f32 1e-05, %v346_v17 }
 0x1dd   :  { %906 = vrsqrt.f32 %v349_v18 }
 0x1e7   :  { %v907_v21 = vpop.eup %906 }
 0x1e8   :  { %v351_v22 = vmul.f32 %v907_v21, %v347_v20 }
 0x1ea   :  { %741 = vmatmul.mubr.msk.f32.vlgmr.msra.gmra.mrb[4].mxu0 %vm356_vm5, %v351_v22  ;;  %v352_v24 = vmul.f32 %v351_v22, %v270_v9 }
 0x1eb   :  { %435 = vmatpush1.msra.mxu0 %v354_v49  ;;  %498 = vmatprep.mubr.f32.mxu0 %v940_v7 }
 0x1ec   :  { %v353_v25 = vsub.f32 %v348_v23, %v352_v24  ;;  %896 = vmatprep.subr.bf16.mxu0 %v941_v13 }
 0x1ee   :  { %742 = vmatmul.mubr.msk.f32.vlgmr.msra.gmra.mrb[6].mxu0 %vm356_vm5, %v353_v25 }
 0x1ef   :  { %898 = vmatpush3.bf16.msra.mxu0 %v897_v44  ;;  %761 = vmatprep.mubr.msk.f32.mxu0 %vm942_vm6, %v940_v7 }
 0x1f0   :  { %899 = vmatprep.subr.bf16.mxu0 %v941_v13 }
 0x2bd   :  { %v426_v48 = vpop.f32.mrb[4].mxu0 }
 0x2be   :  { %v508_v49 = vrot.slane %v426_v48, %v507_v47  ;;  %v428_v50 = vpop.f32.mrb[5].mxu0 }
 0x2bf   :  { %v512_v51 = vrot.slane %v428_v50, %v507_v47 }
 0x2c0   :  { %v513_v52 = vmul.f32 %v508_v49, %v1173_v16  ;;  %v634_v16 = vld [vmem:[%s1329_s7 + $0x18] sm:$0xff]  ;;  %s943_s7 = smov [#allocation2]  }
 0x2c1   :  { %v514_v53 = vmul.f32 %v512_v51, %v1178_v19  ;;  %v500_v54 = vpop.f32.mrb[6].mxu0  ;;  %v900_v19 = vpack.c.bf16 %v634_v16, %v633_v61  ;;  %s728_s30 = sshll.u32 %s943_s7, 4  ;;  %s729_s30 = int_to_ptr.vmem [resolvable:$true] %s728_s30 }
 0x2c2   :  { %v518_v55 = vrot.slane %v500_v54, %v507_v47  ;;  %v502_v56 = vpop.f32.mrb[7].mxu0  ;;  %s916_s9 = scalar_lea.vmem %s729_s30, 32  ;;  %p921_p1 = scmp.lt.s32.totalorder %s729_s30, %s729_s30 }
 0x2c3   :  { %v522_v57 = vrot.slane %v502_v56, %v507_v47  ;;  %901 = vmatpush3.bf16.msra.mxu0 %v900_v19  ;;  %p917_p0 = scmp.ne.s32.totalorder %s729_s30, %s916_s9  ;;  %p922_p2 = scmp.lt.s32.totalorder %s916_s9, %s916_s9 }
 0x2c4   :  { %v523_v58 = vadd.f32 %v518_v55, %v513_v52 }
 0x2c5   :  { %v524_v59 = vadd.f32 %v522_v57, %v514_v53  ;;  %p923_p3 = por %p922_p2, %p921_p1 }
 0x2c7   :  { %908 = vtanh.f32 %v524_v59  ;;  %p924_p4 = pnand %p923_p3, %p917_p0 }
 0x2c8   :  { %910 = vtanh.f32 %v523_v58 }
 0x2d1   :  { %v909_v13 = vpop.eup %908 }
 0x2d2   :  { %v911_v60 = vpop.eup %910  ;;  %744 = vmatprep.mubr.msk.f32.mxu1 %vm196_vm4, %v909_v13 }
 0x2d3   :  { %625 = vmatmul.mubr.f32.vlgmr.msra.gmra.mrb[2].mxu1 %v911_v60 }
 0x3a6   :  { %v626_v63 = vpop.f32.mrb[2].mxu1 }
 0x3a7   :  { %v627_v0 = vadd.f32 %v743_v62, %v626_v63  ;;  %v628_v1 = vpop.f32.mrb[3].mxu1 }
 0x3a9   :  { %v630_v2 = vmax.f32 %v627_v0, 0.0 }
 0x3ab   :  { %762 = vmatmul.mubr.msk.f32.vlgmr.msra.gmra.mrb[8].mxu0 %vm640_vm7, %v630_v2 }
 0x47e   :  { %v710_v4 = vpop.f32.mrb[8].mxu0 }
 0x47f   :  { %v711_v5 = vadd.f32 %v745_v3, %v710_v4  ;;  %v763_v6 = vpop.f32.mrb[9].mxu0 }
 0x481   :  { %v747_v8 = vmul.f32 -1.442695, %v711_v5 }
 0x483   :  { %912 = vpow2.f32 %v747_v8 }
 0x48d   :  { %v913_v7 = vpop.eup %912 }
 0x48e   :  { %v717_v9 = vadd.f32 1.0, %v913_v7 }
 0x490   :  { %914 = vrcp.f32 %v717_v9 }
 0x49a   :  { %v915_v10 = vpop.eup %914 }
 0x49b   :  { %721 = vst.msk [vmem:[#allocation2] sm:$0x3] %vm720_vm8, %v915_v10 }
 0x49c   :  { %927 = shalt.err (!%p924_p4)
}
 0x49d   :  { %s928_s11 = scalar_lea.hbm %s1330_s8, 32 }
 0x49e   :  { %p929_p5 = scmp.ne.s32.totalorder %s1330_s8, %s928_s11  ;;  %p932_p6 = scmp.lt.u32.totalorder %s928_s11, %s1330_s8 }
 0x4a0   :  { %p934_p7 = pnand %p932_p6, %p929_p5 }
 0x4a2   :  { %937 = shalt.err (!%p934_p7)
}
 0x4a3   :  { %731 = dma.vmem_to_hbm [thread:$0]  %s729_s30, 32, %s1330_s8, [#allocation3]  }
 0x4a4   :  { %938 = dma.done.wait [#allocation3], 32  }
 0x4a5   :  { %939 = vsyncadd [#allocation3], 4294967264 }
 0x4a6   :  { %735 = vsyncpa [#allocation3], 1 }

</bundles_post_ra>
